<compile_context>
chip_gen: v6e
topology: v6e:2x2x1
jax: 0.10.0
libtpu: 0.0.40
codegen_flags: <defaults>
</compile_context>

<pallas_src>
import functools

import jax
import jax.numpy as jnp
from jax import lax
from jax.experimental import pallas as pl
from jax.experimental.pallas import tpu as pltpu


def _basic_block_kernel(x_ref, w1_ref, b1_ref, w2_ref, b2_ref, wp_ref, bp_ref,
                        o_ref, pa_ref, pb_ref, pc_ref, y1_ref,
                        *, H, W, cin, cout, dilation):
    """Fused BasicBlock forward for one batch element (channel-major flat layout).

    x_ref : (1, cin, Lx)     zero-padded (Hf, Wf) map, flattened on lanes + zero tail
    w1_ref: (cout, 9*cin)    conv1 weights (BN1 scale folded), columns = (tap, ch)
    b1_ref: (cout, 1)        BN1 shift
    w2_ref: (cout, 9*cout)   conv2 weights (BN2 scale folded)
    b2_ref: (cout, 1)        BN2 shift
    wp_ref: (cout, 9*cin)    projection weights (delta kernel if in_ch == out_ch)
    bp_ref: (cout, 1)        projection bias
    o_ref : (1, cout, H*Wf)  output; flat position i*Wf + j (wrapper keeps j < W)
    pa/pb/pc : VMEM im2col patch scratch (K on sublanes, flat spatial on lanes)
    y1_ref   : VMEM scratch holding the masked conv1 activation (cout, Hf*Wf)
    """
    d = dilation
    Wf = W + 4 * d
    Hf = H + 4 * d
    L1 = Hf * Wf                      # conv1 extended output domain (flat)
    L2 = H * Wf                       # conv2 / residual output domain (flat)
    f32 = jnp.float32

    # Interior mask for conv1's extended domain, built in-kernel (no DMA'd mask).
    # 1.0 where the flat position is a real conv1 output, 0.0 on the d-wide
    # border and on the Wf/Hf fringe — that zero border *is* conv2's padding.
    pos = lax.broadcasted_iota(jnp.int32, (1, L1), 1).astype(f32)
    row = jnp.floor((pos + 0.5) * (1.0 / Wf))
    col = pos - row * Wf
    mask = jnp.where((row >= d) & (row < d + H) & (col >= d) & (col < d + W),
                     1.0, 0.0).astype(f32)

    taps = [(kh, kw) for kh in range(3) for kw in range(3)]

    # ---- conv1 (+ folded BN1) + ReLU over the extended flat domain.
    #      im2col via sublane-block scratch writes -> one (cout,9cin)@(9cin,L1) dot.
    for t, (kh, kw) in enumerate(taps):
        off = kh * d * Wf + kw * d
        pa_ref[pl.ds(t * cin, cin), :] = (
            x_ref[0, :, pl.ds(off, L1)].astype(pa_ref.dtype))
    pre1 = lax.dot_general(w1_ref[...], pa_ref[...], (((1,), (0,)), ((), ())),
                           preferred_element_type=f32)              # (cout, L1)
    y1_ref[...] = jnp.maximum(pre1 + b1_ref[...], 0.0) * mask

    # ---- conv2 (+ folded BN2): patches sliced straight from the y1 scratch.
    for t, (kh, kw) in enumerate(taps):
        off = kh * d * Wf + kw * d
        pb_ref[pl.ds(t * cout, cout), :] = (
            y1_ref[:, pl.ds(off, L2)].astype(pb_ref.dtype))
    y2 = lax.dot_general(w2_ref[...], pb_ref[...], (((1,), (0,)), ((), ())),
                         preferred_element_type=f32) + b2_ref[...]  # (cout, L2)

    # ---- residual = 3x3 projection (pad 1, dil 1); identity uses a delta kernel.
    base = 2 * d - 1
    for t, (kh, kw) in enumerate(taps):
        off = (base + kh) * Wf + (base + kw)
        pc_ref[pl.ds(t * cin, cin), :] = (
            x_ref[0, :, pl.ds(off, L2)].astype(pc_ref.dtype))
    res = lax.dot_general(wp_ref[...], pc_ref[...], (((1,), (0,)), ((), ())),
                          preferred_element_type=f32) + bp_ref[...]  # (cout, L2)

    o_ref[0] = jnp.maximum(y2 + res, 0.0).astype(o_ref.dtype)


def basic_block_forward(x_nchw, params, *, dilation=1, matmul_dtype=jnp.float32):
    """Pallas implementation of BasicBlock.forward(x) (residual=None, stride=1)."""
    n, cin, H, W = x_nchw.shape
    cout = params["w1"].shape[0]
    d = dilation
    eps = 1e-5

    Hf, Wf = H + 4 * d, W + 4 * d
    L1 = Hf * Wf
    L2 = H * Wf
    # Zero tail so every tap's static lane-slice stays in bounds.
    Lx = -(-(L1 + 2 * d * Wf + 2 * d) // 128) * 128
    cin_k = -(-cin // 8) * 8          # lift tiny channel counts to the sublane tile

    s1 = params["bn1_gamma"] * lax.rsqrt(params["bn1_var"] + eps)
    b1 = params["bn1_beta"] - params["bn1_mean"] * s1
    s2 = params["bn2_gamma"] * lax.rsqrt(params["bn2_var"] + eps)
    b2 = params["bn2_beta"] - params["bn2_mean"] * s2

    def im2col_w(w_oihw, cpad):
        # OIHW -> (cout, 9*cpad); column order (kh, kw, channel), zero-padded chans.
        o, c = w_oihw.shape[0], w_oihw.shape[1]
        wt = jnp.transpose(w_oihw, (0, 2, 3, 1))
        wt = jnp.pad(wt, ((0, 0), (0, 0), (0, 0), (0, cpad - c)))
        return wt.reshape(o, 9 * cpad)

    w1m = im2col_w(params["w1"] * s1[:, None, None, None], cin_k).astype(matmul_dtype)
    w2m = im2col_w(params["w2"] * s2[:, None, None, None], cout).astype(matmul_dtype)
    if "w_proj" in params:                                  # in_channels != out_channels
        wp, bp = params["w_proj"], params["b_proj"]
    else:                                                   # identity residual
        wp = jnp.zeros((cout, cin, 3, 3), jnp.float32)
        wp = wp.at[:, :, 1, 1].set(jnp.eye(cout, dtype=jnp.float32))
        bp = jnp.zeros((cout,), jnp.float32)
    wpm = im2col_w(wp.astype(jnp.float32), cin_k).astype(matmul_dtype)

    b1m = b1.reshape(cout, 1).astype(jnp.float32)
    b2m = b2.reshape(cout, 1).astype(jnp.float32)
    bpm = bp.reshape(cout, 1).astype(jnp.float32)

    # Channel-major layout: channels on sublanes, flat padded spatial on lanes.
    # (No NCHW->NHWC transpose; just zero-pad + reshape, fused under jit.)
    xp = jnp.pad(x_nchw, ((0, 0), (0, 0), (2 * d, 2 * d), (2 * d, 2 * d)))
    x_flat = jnp.pad(xp.reshape(n, cin, L1),
                     ((0, 0), (0, cin_k - cin), (0, Lx - L1)))

    kernel = functools.partial(_basic_block_kernel,
                               H=H, W=W, cin=cin_k, cout=cout, dilation=d)

    out = pl.pallas_call(
        kernel,
        out_shape=jax.ShapeDtypeStruct((n, cout, L2), x_nchw.dtype),
        grid=(n,),
        in_specs=[
            pl.BlockSpec((1, cin_k, Lx), lambda i: (i, 0, 0)),
            pl.BlockSpec((cout, 9 * cin_k), lambda i: (0, 0)),
            pl.BlockSpec((cout, 1), lambda i: (0, 0)),
            pl.BlockSpec((cout, 9 * cout), lambda i: (0, 0)),
            pl.BlockSpec((cout, 1), lambda i: (0, 0)),
            pl.BlockSpec((cout, 9 * cin_k), lambda i: (0, 0)),
            pl.BlockSpec((cout, 1), lambda i: (0, 0)),
        ],
        out_specs=pl.BlockSpec((1, cout, L2), lambda i: (i, 0, 0)),
        scratch_shapes=[
            pltpu.VMEM((9 * cin_k, L1), matmul_dtype),   # conv1 patches
            pltpu.VMEM((9 * cout, L2), matmul_dtype),    # conv2 patches
            pltpu.VMEM((9 * cin_k, L2), matmul_dtype),   # projection patches
            pltpu.VMEM((cout, L1), jnp.float32),         # conv1 activation
        ],
        compiler_params=pltpu.CompilerParams(
            dimension_semantics=("parallel",)),
    )(x_flat, w1m, b1m, w2m, b2m, wpm, bpm)

    # (N, cout, H*Wf) -> keep only the valid j < W columns of each Wf-wide row.
    return out.reshape(n, cout, H, Wf)[:, :, :, :W]


# ----------------------------- pure-JAX reference -----------------------------

def _conv_ref(x, w, dil, pad, bias=None):
    y = lax.conv_general_dilated(
        x, w, window_strides=(1, 1), padding=[(pad, pad), (pad, pad)],
        rhs_dilation=(dil, dil), dimension_numbers=("NCHW", "OIHW", "NCHW"))
    if bias is not None:
        y = y + bias[None, :, None, None]
    return y


def _bn_ref(y, gamma, beta, mean, var, eps=1e-5):
    s = gamma / jnp.sqrt(var + eps)
    return y * s[None, :, None, None] + (beta - mean * s)[None, :, None, None]


def basic_block_ref(x, params, *, dilation=1):
    out = _conv_ref(x, params["w1"], dilation, dilation)
    out = jnp.maximum(_bn_ref(out, params["bn1_gamma"], params["bn1_beta"],
                              params["bn1_mean"], params["bn1_var"]), 0.0)
    out = _conv_ref(out, params["w2"], dilation, dilation)
    out = _bn_ref(out, params["bn2_gamma"], params["bn2_beta"],
                  params["bn2_mean"], params["bn2_var"])
    if "w_proj" in params:
        residual = _conv_ref(x, params["w_proj"], 1, 1, params["b_proj"])
    else:
        residual = x
    return jnp.maximum(out + residual, 0.0)


# ------------------------------------ main ------------------------------------

if __name__ == "__main__":
    N, C_IN, C_OUT, H, W = 2, 4, 8, 16, 16
    DILATION = 1

    key = jax.random.PRNGKey(0)
    keys = jax.random.split(key, 16)

    params = {
        # conv weights in PyTorch OIHW layout
        "w1": jax.random.normal(keys[0], (C_OUT, C_IN, 3, 3), jnp.float32) * 0.1,
        "w2": jax.random.normal(keys[1], (C_OUT, C_OUT, 3, 3), jnp.float32) * 0.1,
        "w_proj": jax.random.normal(keys[2], (C_OUT, C_IN, 3, 3), jnp.float32) * 0.1,
        "b_proj": jax.random.normal(keys[3], (C_OUT,), jnp.float32) * 0.1,
        # BN1 (inference-mode parameters)
        "bn1_gamma": jax.random.uniform(keys[4], (C_OUT,), jnp.float32, 0.5, 1.5),
        "bn1_beta": jax.random.normal(keys[5], (C_OUT,), jnp.float32) * 0.1,
        "bn1_mean": jax.random.normal(keys[6], (C_OUT,), jnp.float32) * 0.1,
        "bn1_var": jax.random.uniform(keys[7], (C_OUT,), jnp.float32, 0.5, 1.5),
        # BN2
        "bn2_gamma": jax.random.uniform(keys[8], (C_OUT,), jnp.float32, 0.5, 1.5),
        "bn2_beta": jax.random.normal(keys[9], (C_OUT,), jnp.float32) * 0.1,
        "bn2_mean": jax.random.normal(keys[10], (C_OUT,), jnp.float32) * 0.1,
        "bn2_var": jax.random.uniform(keys[11], (C_OUT,), jnp.float32, 0.5, 1.5),
    }

    x = jax.random.normal(keys[12], (N, C_IN, H, W), jnp.float32)

    fwd = jax.jit(functools.partial(basic_block_forward, dilation=DILATION))
    out = jax.block_until_ready(fwd(x, params))

    ref = jax.block_until_ready(basic_block_ref(x, params, dilation=DILATION))

    assert out.shape == (N, C_OUT, H, W), out.shape
    max_err = float(jnp.max(jnp.abs(out - ref)))
    # 2e-3 tolerance covers possible reduced-precision default MXU paths for f32
    # dots on some generations; genuine kernel bugs show errors orders larger.
    assert jnp.allclose(out, ref, atol=2e-3, rtol=2e-3), max_err

    print("KERNEL_OK")
</pallas_src>

<mosaic_0001>
module attributes {stable_mosaic.version = 11 : i64} {
  func.func @_basic_block_kernel(%arg0: i32, %arg1: memref<1x8x512xf32, #tpu.memory_space<vmem>>, %arg2: memref<8x72xf32, #tpu.memory_space<vmem>>, %arg3: memref<8x1xf32, #tpu.memory_space<vmem>>, %arg4: memref<8x72xf32, #tpu.memory_space<vmem>>, %arg5: memref<8x1xf32, #tpu.memory_space<vmem>>, %arg6: memref<8x72xf32, #tpu.memory_space<vmem>>, %arg7: memref<8x1xf32, #tpu.memory_space<vmem>>, %arg8: memref<1x8x320xf32, #tpu.memory_space<vmem>>, %arg9: memref<72x400xf32, #tpu.memory_space<vmem>>, %arg10: memref<72x320xf32, #tpu.memory_space<vmem>>, %arg11: memref<72x320xf32, #tpu.memory_space<vmem>>, %arg12: memref<8x400xf32, #tpu.memory_space<vmem>>) attributes {dimension_semantics = [#tpu.dimension_semantics<parallel>], iteration_bounds = array<i64: 2>, scalar_prefetch = 0 : i64, scratch_operands = 4 : i64, tpu.core_type = #tpu.core_type<tc>, window_params = [{transform_indices = @transform_0, window_bounds = array<i64: 1, 8, 512>}, {pipeline_mode = #tpu.pipeline_mode<synchronous>, transform_indices = @transform_1, window_bounds = array<i64: 8, 72>}, {pipeline_mode = #tpu.pipeline_mode<synchronous>, transform_indices = @transform_2, window_bounds = array<i64: 8, 1>}, {pipeline_mode = #tpu.pipeline_mode<synchronous>, transform_indices = @transform_3, window_bounds = array<i64: 8, 72>}, {pipeline_mode = #tpu.pipeline_mode<synchronous>, transform_indices = @transform_4, window_bounds = array<i64: 8, 1>}, {pipeline_mode = #tpu.pipeline_mode<synchronous>, transform_indices = @transform_5, window_bounds = array<i64: 8, 72>}, {pipeline_mode = #tpu.pipeline_mode<synchronous>, transform_indices = @transform_6, window_bounds = array<i64: 8, 1>}, {transform_indices = @transform_7, window_bounds = array<i64: 1, 8, 320>}]} {
    %0 = tpu.iota {dimensions = array<i32: 1>} : vector<1x400xi32>
    %1 = arith.sitofp %0 : vector<1x400xi32> to vector<1x400xf32>
    %cst = arith.constant 5.000000e-01 : f32
    %2 = vector.broadcast %cst : f32 to vector<1x400xf32>
    %3 = arith.addf %1, %2 : vector<1x400xf32>
    %cst_0 = arith.constant 5.000000e-02 : f32
    %4 = vector.broadcast %cst_0 : f32 to vector<1x400xf32>
    %5 = arith.mulf %3, %4 : vector<1x400xf32>
    %6 = math.floor %5 : vector<1x400xf32>
    %cst_1 = arith.constant 2.000000e+01 : f32
    %7 = vector.broadcast %cst_1 : f32 to vector<1x400xf32>
    %8 = arith.mulf %6, %7 : vector<1x400xf32>
    %9 = arith.subf %1, %8 : vector<1x400xf32>
    %cst_2 = arith.constant 1.000000e+00 : f32
    %10 = vector.broadcast %cst_2 : f32 to vector<1x400xf32>
    %11 = arith.cmpf oge, %6, %10 : vector<1x400xf32>
    %cst_3 = arith.constant 1.700000e+01 : f32
    %12 = vector.broadcast %cst_3 : f32 to vector<1x400xf32>
    %13 = arith.cmpf olt, %6, %12 : vector<1x400xf32>
    %14 = arith.andi %11, %13 : vector<1x400xi1>
    %cst_4 = arith.constant 1.000000e+00 : f32
    %15 = vector.broadcast %cst_4 : f32 to vector<1x400xf32>
    %16 = arith.cmpf oge, %9, %15 : vector<1x400xf32>
    %17 = arith.andi %14, %16 : vector<1x400xi1>
    %cst_5 = arith.constant 1.700000e+01 : f32
    %18 = vector.broadcast %cst_5 : f32 to vector<1x400xf32>
    %19 = arith.cmpf olt, %9, %18 : vector<1x400xf32>
    %20 = arith.andi %17, %19 : vector<1x400xi1>
    %cst_6 = arith.constant 1.000000e+00 : f32
    %cst_7 = arith.constant 0.000000e+00 : f32
    %21 = vector.broadcast %cst_6 : f32 to vector<1x400xf32>
    %22 = vector.broadcast %cst_7 : f32 to vector<1x400xf32>
    %23 = arith.select %20, %21, %22 : vector<1x400xi1>, vector<1x400xf32>
    %c0 = arith.constant 0 : index
    %c0_8 = arith.constant 0 : index
    %c0_9 = arith.constant 0 : index
    %24 = vector.load %arg1[%c0, %c0_8, %c0_9] : memref<1x8x512xf32, #tpu.memory_space<vmem>>, vector<1x8x400xf32>
    %25 = vector.shape_cast %24 : vector<1x8x400xf32> to vector<8x400xf32>
    %c0_10 = arith.constant 0 : index
    %c0_11 = arith.constant 0 : index
    %26 = vector.load %arg9[%c0_10, %c0_11] : memref<72x400xf32, #tpu.memory_space<vmem>>, vector<8x400xf32>
    tpu.vector_store %arg9[%c0_10, %c0_11], %25 {strides = array<i32>} : memref<72x400xf32, #tpu.memory_space<vmem>>, vector<8x400xf32>,
    %c0_12 = arith.constant 0 : index
    %c0_13 = arith.constant 0 : index
    %c1 = arith.constant 1 : index
    %27 = vector.load %arg1[%c0_12, %c0_13, %c1] : memref<1x8x512xf32, #tpu.memory_space<vmem>>, vector<1x8x400xf32>
    %28 = vector.shape_cast %27 : vector<1x8x400xf32> to vector<8x400xf32>
    %c8 = arith.constant 8 : index
    %c0_14 = arith.constant 0 : index
    %29 = vector.load %arg9[%c8, %c0_14] : memref<72x400xf32, #tpu.memory_space<vmem>>, vector<8x400xf32>
    tpu.vector_store %arg9[%c8, %c0_14], %28 {strides = array<i32>} : memref<72x400xf32, #tpu.memory_space<vmem>>, vector<8x400xf32>,
    %c0_15 = arith.constant 0 : index
    %c0_16 = arith.constant 0 : index
    %c2 = arith.constant 2 : index
    %30 = vector.load %arg1[%c0_15, %c0_16, %c2] : memref<1x8x512xf32, #tpu.memory_space<vmem>>, vector<1x8x400xf32>
    %31 = vector.shape_cast %30 : vector<1x8x400xf32> to vector<8x400xf32>
    %c16 = arith.constant 16 : index
    %c0_17 = arith.constant 0 : index
    %32 = vector.load %arg9[%c16, %c0_17] : memref<72x400xf32, #tpu.memory_space<vmem>>, vector<8x400xf32>
    tpu.vector_store %arg9[%c16, %c0_17], %31 {strides = array<i32>} : memref<72x400xf32, #tpu.memory_space<vmem>>, vector<8x400xf32>,
    %c0_18 = arith.constant 0 : index
    %c0_19 = arith.constant 0 : index
    %c20 = arith.constant 20 : index
    %33 = vector.load %arg1[%c0_18, %c0_19, %c20] : memref<1x8x512xf32, #tpu.memory_space<vmem>>, vector<1x8x400xf32>
    %34 = vector.shape_cast %33 : vector<1x8x400xf32> to vector<8x400xf32>
    %c24 = arith.constant 24 : index
    %c0_20 = arith.constant 0 : index
    %35 = vector.load %arg9[%c24, %c0_20] : memref<72x400xf32, #tpu.memory_space<vmem>>, vector<8x400xf32>
    tpu.vector_store %arg9[%c24, %c0_20], %34 {strides = array<i32>} : memref<72x400xf32, #tpu.memory_space<vmem>>, vector<8x400xf32>,
    %c0_21 = arith.constant 0 : index
    %c0_22 = arith.constant 0 : index
    %c21 = arith.constant 21 : index
    %36 = vector.load %arg1[%c0_21, %c0_22, %c21] : memref<1x8x512xf32, #tpu.memory_space<vmem>>, vector<1x8x400xf32>
    %37 = vector.shape_cast %36 : vector<1x8x400xf32> to vector<8x400xf32>
    %c32 = arith.constant 32 : index
    %c0_23 = arith.constant 0 : index
    %38 = vector.load %arg9[%c32, %c0_23] : memref<72x400xf32, #tpu.memory_space<vmem>>, vector<8x400xf32>
    tpu.vector_store %arg9[%c32, %c0_23], %37 {strides = array<i32>} : memref<72x400xf32, #tpu.memory_space<vmem>>, vector<8x400xf32>,
    %c0_24 = arith.constant 0 : index
    %c0_25 = arith.constant 0 : index
    %c22 = arith.constant 22 : index
    %39 = vector.load %arg1[%c0_24, %c0_25, %c22] : memref<1x8x512xf32, #tpu.memory_space<vmem>>, vector<1x8x400xf32>
    %40 = vector.shape_cast %39 : vector<1x8x400xf32> to vector<8x400xf32>
    %c40 = arith.constant 40 : index
    %c0_26 = arith.constant 0 : index
    %41 = vector.load %arg9[%c40, %c0_26] : memref<72x400xf32, #tpu.memory_space<vmem>>, vector<8x400xf32>
    tpu.vector_store %arg9[%c40, %c0_26], %40 {strides = array<i32>} : memref<72x400xf32, #tpu.memory_space<vmem>>, vector<8x400xf32>,
    %c0_27 = arith.constant 0 : index
    %c0_28 = arith.constant 0 : index
    %c40_29 = arith.constant 40 : index
    %42 = vector.load %arg1[%c0_27, %c0_28, %c40_29] : memref<1x8x512xf32, #tpu.memory_space<vmem>>, vector<1x8x400xf32>
    %43 = vector.shape_cast %42 : vector<1x8x400xf32> to vector<8x400xf32>
    %c48 = arith.constant 48 : index
    %c0_30 = arith.constant 0 : index
    %44 = vector.load %arg9[%c48, %c0_30] : memref<72x400xf32, #tpu.memory_space<vmem>>, vector<8x400xf32>
    tpu.vector_store %arg9[%c48, %c0_30], %43 {strides = array<i32>} : memref<72x400xf32, #tpu.memory_space<vmem>>, vector<8x400xf32>,
    %c0_31 = arith.constant 0 : index
    %c0_32 = arith.constant 0 : index
    %c41 = arith.constant 41 : index
    %45 = vector.load %arg1[%c0_31, %c0_32, %c41] : memref<1x8x512xf32, #tpu.memory_space<vmem>>, vector<1x8x400xf32>
    %46 = vector.shape_cast %45 : vector<1x8x400xf32> to vector<8x400xf32>
    %c56 = arith.constant 56 : index
    %c0_33 = arith.constant 0 : index
    %47 = vector.load %arg9[%c56, %c0_33] : memref<72x400xf32, #tpu.memory_space<vmem>>, vector<8x400xf32>
    tpu.vector_store %arg9[%c56, %c0_33], %46 {strides = array<i32>} : memref<72x400xf32, #tpu.memory_space<vmem>>, vector<8x400xf32>,
    %c0_34 = arith.constant 0 : index
    %c0_35 = arith.constant 0 : index
    %c42 = arith.constant 42 : index
    %48 = vector.load %arg1[%c0_34, %c0_35, %c42] : memref<1x8x512xf32, #tpu.memory_space<vmem>>, vector<1x8x400xf32>
    %49 = vector.shape_cast %48 : vector<1x8x400xf32> to vector<8x400xf32>
    %c64 = arith.constant 64 : index
    %c0_36 = arith.constant 0 : index
    %50 = vector.load %arg9[%c64, %c0_36] : memref<72x400xf32, #tpu.memory_space<vmem>>, vector<8x400xf32>
    tpu.vector_store %arg9[%c64, %c0_36], %49 {strides = array<i32>} : memref<72x400xf32, #tpu.memory_space<vmem>>, vector<8x400xf32>,
    %c0_37 = arith.constant 0 : index
    %c0_38 = arith.constant 0 : index
    %51 = vector.load %arg2[%c0_37, %c0_38] : memref<8x72xf32, #tpu.memory_space<vmem>>, vector<8x72xf32>
    %c0_39 = arith.constant 0 : index
    %c0_40 = arith.constant 0 : index
    %52 = vector.load %arg9[%c0_39, %c0_40] : memref<72x400xf32, #tpu.memory_space<vmem>>, vector<72x400xf32>
    %cst_41 = arith.constant dense<0.000000e+00> : vector<8x400xf32>
    %53 = tpu.matmul %51, %52, %cst_41 {dimension_numbers = #tpu.dot_dimension_numbers<[1], [0], [0], [1], [0, 0, 1, 1], [], []>} : vector<8x72xf32>, vector<72x400xf32>, vector<8x400xf32> -> vector<8x400xf32>
    %c0_42 = arith.constant 0 : index
    %c0_43 = arith.constant 0 : index
    %54 = vector.load %arg3[%c0_42, %c0_43] : memref<8x1xf32, #tpu.memory_space<vmem>>, vector<8x1xf32>
    %55 = vector.broadcast %54 : vector<8x1xf32> to vector<8x400xf32>
    %56 = arith.addf %53, %55 : vector<8x400xf32>
    %cst_44 = arith.constant 0.000000e+00 : f32
    %57 = vector.broadcast %cst_44 : f32 to vector<8x400xf32>
    %58 = arith.maximumf %56, %57 : vector<8x400xf32>
    %59 = vector.broadcast %23 : vector<1x400xf32> to vector<8x400xf32>
    %60 = arith.mulf %58, %59 : vector<8x400xf32>
    %c0_45 = arith.constant 0 : index
    %c0_46 = arith.constant 0 : index
    %61 = vector.load %arg12[%c0_45, %c0_46] : memref<8x400xf32, #tpu.memory_space<vmem>>, vector<8x400xf32>
    tpu.vector_store %arg12[%c0_45, %c0_46], %60 {strides = array<i32>} : memref<8x400xf32, #tpu.memory_space<vmem>>, vector<8x400xf32>,
    %c0_47 = arith.constant 0 : index
    %c0_48 = arith.constant 0 : index
    %62 = vector.load %arg12[%c0_47, %c0_48] : memref<8x400xf32, #tpu.memory_space<vmem>>, vector<8x320xf32>
    %c0_49 = arith.constant 0 : index
    %c0_50 = arith.constant 0 : index
    %63 = vector.load %arg10[%c0_49, %c0_50] : memref<72x320xf32, #tpu.memory_space<vmem>>, vector<8x320xf32>
    tpu.vector_store %arg10[%c0_49, %c0_50], %62 {strides = array<i32>} : memref<72x320xf32, #tpu.memory_space<vmem>>, vector<8x320xf32>,
    %c0_51 = arith.constant 0 : index
    %c1_52 = arith.constant 1 : index
    %64 = vector.load %arg12[%c0_51, %c1_52] : memref<8x400xf32, #tpu.memory_space<vmem>>, vector<8x320xf32>
    %c8_53 = arith.constant 8 : index
    %c0_54 = arith.constant 0 : index
    %65 = vector.load %arg10[%c8_53, %c0_54] : memref<72x320xf32, #tpu.memory_space<vmem>>, vector<8x320xf32>
    tpu.vector_store %arg10[%c8_53, %c0_54], %64 {strides = array<i32>} : memref<72x320xf32, #tpu.memory_space<vmem>>, vector<8x320xf32>,
    %c0_55 = arith.constant 0 : index
    %c2_56 = arith.constant 2 : index
    %66 = vector.load %arg12[%c0_55, %c2_56] : memref<8x400xf32, #tpu.memory_space<vmem>>, vector<8x320xf32>
    %c16_57 = arith.constant 16 : index
    %c0_58 = arith.constant 0 : index
    %67 = vector.load %arg10[%c16_57, %c0_58] : memref<72x320xf32, #tpu.memory_space<vmem>>, vector<8x320xf32>
    tpu.vector_store %arg10[%c16_57, %c0_58], %66 {strides = array<i32>} : memref<72x320xf32, #tpu.memory_space<vmem>>, vector<8x320xf32>,
    %c0_59 = arith.constant 0 : index
    %c20_60 = arith.constant 20 : index
    %68 = vector.load %arg12[%c0_59, %c20_60] : memref<8x400xf32, #tpu.memory_space<vmem>>, vector<8x320xf32>
    %c24_61 = arith.constant 24 : index
    %c0_62 = arith.constant 0 : index
    %69 = vector.load %arg10[%c24_61, %c0_62] : memref<72x320xf32, #tpu.memory_space<vmem>>, vector<8x320xf32>
    tpu.vector_store %arg10[%c24_61, %c0_62], %68 {strides = array<i32>} : memref<72x320xf32, #tpu.memory_space<vmem>>, vector<8x320xf32>,
    %c0_63 = arith.constant 0 : index
    %c21_64 = arith.constant 21 : index
    %70 = vector.load %arg12[%c0_63, %c21_64] : memref<8x400xf32, #tpu.memory_space<vmem>>, vector<8x320xf32>
    %c32_65 = arith.constant 32 : index
    %c0_66 = arith.constant 0 : index
    %71 = vector.load %arg10[%c32_65, %c0_66] : memref<72x320xf32, #tpu.memory_space<vmem>>, vector<8x320xf32>
    tpu.vector_store %arg10[%c32_65, %c0_66], %70 {strides = array<i32>} : memref<72x320xf32, #tpu.memory_space<vmem>>, vector<8x320xf32>,
    %c0_67 = arith.constant 0 : index
    %c22_68 = arith.constant 22 : index
    %72 = vector.load %arg12[%c0_67, %c22_68] : memref<8x400xf32, #tpu.memory_space<vmem>>, vector<8x320xf32>
    %c40_69 = arith.constant 40 : index
    %c0_70 = arith.constant 0 : index
    %73 = vector.load %arg10[%c40_69, %c0_70] : memref<72x320xf32, #tpu.memory_space<vmem>>, vector<8x320xf32>
    tpu.vector_store %arg10[%c40_69, %c0_70], %72 {strides = array<i32>} : memref<72x320xf32, #tpu.memory_space<vmem>>, vector<8x320xf32>,
    %c0_71 = arith.constant 0 : index
    %c40_72 = arith.constant 40 : index
    %74 = vector.load %arg12[%c0_71, %c40_72] : memref<8x400xf32, #tpu.memory_space<vmem>>, vector<8x320xf32>
    %c48_73 = arith.constant 48 : index
    %c0_74 = arith.constant 0 : index
    %75 = vector.load %arg10[%c48_73, %c0_74] : memref<72x320xf32, #tpu.memory_space<vmem>>, vector<8x320xf32>
    tpu.vector_store %arg10[%c48_73, %c0_74], %74 {strides = array<i32>} : memref<72x320xf32, #tpu.memory_space<vmem>>, vector<8x320xf32>,
    %c0_75 = arith.constant 0 : index
    %c41_76 = arith.constant 41 : index
    %76 = vector.load %arg12[%c0_75, %c41_76] : memref<8x400xf32, #tpu.memory_space<vmem>>, vector<8x320xf32>
    %c56_77 = arith.constant 56 : index
    %c0_78 = arith.constant 0 : index
    %77 = vector.load %arg10[%c56_77, %c0_78] : memref<72x320xf32, #tpu.memory_space<vmem>>, vector<8x320xf32>
    tpu.vector_store %arg10[%c56_77, %c0_78], %76 {strides = array<i32>} : memref<72x320xf32, #tpu.memory_space<vmem>>, vector<8x320xf32>,
    %c0_79 = arith.constant 0 : index
    %c42_80 = arith.constant 42 : index
    %78 = vector.load %arg12[%c0_79, %c42_80] : memref<8x400xf32, #tpu.memory_space<vmem>>, vector<8x320xf32>
    %c64_81 = arith.constant 64 : index
    %c0_82 = arith.constant 0 : index
    %79 = vector.load %arg10[%c64_81, %c0_82] : memref<72x320xf32, #tpu.memory_space<vmem>>, vector<8x320xf32>
    tpu.vector_store %arg10[%c64_81, %c0_82], %78 {strides = array<i32>} : memref<72x320xf32, #tpu.memory_space<vmem>>, vector<8x320xf32>,
    %c0_83 = arith.constant 0 : index
    %c0_84 = arith.constant 0 : index
    %80 = vector.load %arg4[%c0_83, %c0_84] : memref<8x72xf32, #tpu.memory_space<vmem>>, vector<8x72xf32>
    %c0_85 = arith.constant 0 : index
    %c0_86 = arith.constant 0 : index
    %81 = vector.load %arg10[%c0_85, %c0_86] : memref<72x320xf32, #tpu.memory_space<vmem>>, vector<72x320xf32>
    %cst_87 = arith.constant dense<0.000000e+00> : vector<8x320xf32>
    %82 = tpu.matmul %80, %81, %cst_87 {dimension_numbers = #tpu.dot_dimension_numbers<[1], [0], [0], [1], [0, 0, 1, 1], [], []>} : vector<8x72xf32>, vector<72x320xf32>, vector<8x320xf32> -> vector<8x320xf32>
    %c0_88 = arith.constant 0 : index
    %c0_89 = arith.constant 0 : index
    %83 = vector.load %arg5[%c0_88, %c0_89] : memref<8x1xf32, #tpu.memory_space<vmem>>, vector<8x1xf32>
    %84 = vector.broadcast %83 : vector<8x1xf32> to vector<8x320xf32>
    %85 = arith.addf %82, %84 : vector<8x320xf32>
    %c0_90 = arith.constant 0 : index
    %c0_91 = arith.constant 0 : index
    %c21_92 = arith.constant 21 : index
    %86 = vector.load %arg1[%c0_90, %c0_91, %c21_92] : memref<1x8x512xf32, #tpu.memory_space<vmem>>, vector<1x8x320xf32>
    %87 = vector.shape_cast %86 : vector<1x8x320xf32> to vector<8x320xf32>
    %c0_93 = arith.constant 0 : index
    %c0_94 = arith.constant 0 : index
    %88 = vector.load %arg11[%c0_93, %c0_94] : memref<72x320xf32, #tpu.memory_space<vmem>>, vector<8x320xf32>
    tpu.vector_store %arg11[%c0_93, %c0_94], %87 {strides = array<i32>} : memref<72x320xf32, #tpu.memory_space<vmem>>, vector<8x320xf32>,
    %c0_95 = arith.constant 0 : index
    %c0_96 = arith.constant 0 : index
    %c22_97 = arith.constant 22 : index
    %89 = vector.load %arg1[%c0_95, %c0_96, %c22_97] : memref<1x8x512xf32, #tpu.memory_space<vmem>>, vector<1x8x320xf32>
    %90 = vector.shape_cast %89 : vector<1x8x320xf32> to vector<8x320xf32>
    %c8_98 = arith.constant 8 : index
    %c0_99 = arith.constant 0 : index
    %91 = vector.load %arg11[%c8_98, %c0_99] : memref<72x320xf32, #tpu.memory_space<vmem>>, vector<8x320xf32>
    tpu.vector_store %arg11[%c8_98, %c0_99], %90 {strides = array<i32>} : memref<72x320xf32, #tpu.memory_space<vmem>>, vector<8x320xf32>,
    %c0_100 = arith.constant 0 : index
    %c0_101 = arith.constant 0 : index
    %c23 = arith.constant 23 : index
    %92 = vector.load %arg1[%c0_100, %c0_101, %c23] : memref<1x8x512xf32, #tpu.memory_space<vmem>>, vector<1x8x320xf32>
    %93 = vector.shape_cast %92 : vector<1x8x320xf32> to vector<8x320xf32>
    %c16_102 = arith.constant 16 : index
    %c0_103 = arith.constant 0 : index
    %94 = vector.load %arg11[%c16_102, %c0_103] : memref<72x320xf32, #tpu.memory_space<vmem>>, vector<8x320xf32>
    tpu.vector_store %arg11[%c16_102, %c0_103], %93 {strides = array<i32>} : memref<72x320xf32, #tpu.memory_space<vmem>>, vector<8x320xf32>,
    %c0_104 = arith.constant 0 : index
    %c0_105 = arith.constant 0 : index
    %c41_106 = arith.constant 41 : index
    %95 = vector.load %arg1[%c0_104, %c0_105, %c41_106] : memref<1x8x512xf32, #tpu.memory_space<vmem>>, vector<1x8x320xf32>
    %96 = vector.shape_cast %95 : vector<1x8x320xf32> to vector<8x320xf32>
    %c24_107 = arith.constant 24 : index
    %c0_108 = arith.constant 0 : index
    %97 = vector.load %arg11[%c24_107, %c0_108] : memref<72x320xf32, #tpu.memory_space<vmem>>, vector<8x320xf32>
    tpu.vector_store %arg11[%c24_107, %c0_108], %96 {strides = array<i32>} : memref<72x320xf32, #tpu.memory_space<vmem>>, vector<8x320xf32>,
    %c0_109 = arith.constant 0 : index
    %c0_110 = arith.constant 0 : index
    %c42_111 = arith.constant 42 : index
    %98 = vector.load %arg1[%c0_109, %c0_110, %c42_111] : memref<1x8x512xf32, #tpu.memory_space<vmem>>, vector<1x8x320xf32>
    %99 = vector.shape_cast %98 : vector<1x8x320xf32> to vector<8x320xf32>
    %c32_112 = arith.constant 32 : index
    %c0_113 = arith.constant 0 : index
    %100 = vector.load %arg11[%c32_112, %c0_113] : memref<72x320xf32, #tpu.memory_space<vmem>>, vector<8x320xf32>
    tpu.vector_store %arg11[%c32_112, %c0_113], %99 {strides = array<i32>} : memref<72x320xf32, #tpu.memory_space<vmem>>, vector<8x320xf32>,
    %c0_114 = arith.constant 0 : index
    %c0_115 = arith.constant 0 : index
    %c43 = arith.constant 43 : index
    %101 = vector.load %arg1[%c0_114, %c0_115, %c43] : memref<1x8x512xf32, #tpu.memory_space<vmem>>, vector<1x8x320xf32>
    %102 = vector.shape_cast %101 : vector<1x8x320xf32> to vector<8x320xf32>
    %c40_116 = arith.constant 40 : index
    %c0_117 = arith.constant 0 : index
    %103 = vector.load %arg11[%c40_116, %c0_117] : memref<72x320xf32, #tpu.memory_space<vmem>>, vector<8x320xf32>
    tpu.vector_store %arg11[%c40_116, %c0_117], %102 {strides = array<i32>} : memref<72x320xf32, #tpu.memory_space<vmem>>, vector<8x320xf32>,
    %c0_118 = arith.constant 0 : index
    %c0_119 = arith.constant 0 : index
    %c61 = arith.constant 61 : index
    %104 = vector.load %arg1[%c0_118, %c0_119, %c61] : memref<1x8x512xf32, #tpu.memory_space<vmem>>, vector<1x8x320xf32>
    %105 = vector.shape_cast %104 : vector<1x8x320xf32> to vector<8x320xf32>
    %c48_120 = arith.constant 48 : index
    %c0_121 = arith.constant 0 : index
    %106 = vector.load %arg11[%c48_120, %c0_121] : memref<72x320xf32, #tpu.memory_space<vmem>>, vector<8x320xf32>
    tpu.vector_store %arg11[%c48_120, %c0_121], %105 {strides = array<i32>} : memref<72x320xf32, #tpu.memory_space<vmem>>, vector<8x320xf32>,
    %c0_122 = arith.constant 0 : index
    %c0_123 = arith.constant 0 : index
    %c62 = arith.constant 62 : index
    %107 = vector.load %arg1[%c0_122, %c0_123, %c62] : memref<1x8x512xf32, #tpu.memory_space<vmem>>, vector<1x8x320xf32>
    %108 = vector.shape_cast %107 : vector<1x8x320xf32> to vector<8x320xf32>
    %c56_124 = arith.constant 56 : index
    %c0_125 = arith.constant 0 : index
    %109 = vector.load %arg11[%c56_124, %c0_125] : memref<72x320xf32, #tpu.memory_space<vmem>>, vector<8x320xf32>
    tpu.vector_store %arg11[%c56_124, %c0_125], %108 {strides = array<i32>} : memref<72x320xf32, #tpu.memory_space<vmem>>, vector<8x320xf32>,
    %c0_126 = arith.constant 0 : index
    %c0_127 = arith.constant 0 : index
    %c63 = arith.constant 63 : index
    %110 = vector.load %arg1[%c0_126, %c0_127, %c63] : memref<1x8x512xf32, #tpu.memory_space<vmem>>, vector<1x8x320xf32>
    %111 = vector.shape_cast %110 : vector<1x8x320xf32> to vector<8x320xf32>
    %c64_128 = arith.constant 64 : index
    %c0_129 = arith.constant 0 : index
    %112 = vector.load %arg11[%c64_128, %c0_129] : memref<72x320xf32, #tpu.memory_space<vmem>>, vector<8x320xf32>
    tpu.vector_store %arg11[%c64_128, %c0_129], %111 {strides = array<i32>} : memref<72x320xf32, #tpu.memory_space<vmem>>, vector<8x320xf32>,
    %c0_130 = arith.constant 0 : index
    %c0_131 = arith.constant 0 : index
    %113 = vector.load %arg6[%c0_130, %c0_131] : memref<8x72xf32, #tpu.memory_space<vmem>>, vector<8x72xf32>
    %c0_132 = arith.constant 0 : index
    %c0_133 = arith.constant 0 : index
    %114 = vector.load %arg11[%c0_132, %c0_133] : memref<72x320xf32, #tpu.memory_space<vmem>>, vector<72x320xf32>
    %cst_134 = arith.constant dense<0.000000e+00> : vector<8x320xf32>
    %115 = tpu.matmul %113, %114, %cst_134 {dimension_numbers = #tpu.dot_dimension_numbers<[1], [0], [0], [1], [0, 0, 1, 1], [], []>} : vector<8x72xf32>, vector<72x320xf32>, vector<8x320xf32> -> vector<8x320xf32>
    %c0_135 = arith.constant 0 : index
    %c0_136 = arith.constant 0 : index
    %116 = vector.load %arg7[%c0_135, %c0_136] : memref<8x1xf32, #tpu.memory_space<vmem>>, vector<8x1xf32>
    %117 = vector.broadcast %116 : vector<8x1xf32> to vector<8x320xf32>
    %118 = arith.addf %115, %117 : vector<8x320xf32>
    %119 = arith.addf %85, %118 : vector<8x320xf32>
    %cst_137 = arith.constant 0.000000e+00 : f32
    %120 = vector.broadcast %cst_137 : f32 to vector<8x320xf32>
    %121 = arith.maximumf %119, %120 : vector<8x320xf32>
    %c0_138 = arith.constant 0 : index
    %c0_139 = arith.constant 0 : index
    %c0_140 = arith.constant 0 : index
    %122 = vector.load %arg8[%c0_138, %c0_139, %c0_140] : memref<1x8x320xf32, #tpu.memory_space<vmem>>, vector<1x8x320xf32>
    %123 = vector.shape_cast %122 : vector<1x8x320xf32> to vector<8x320xf32>
    %124 = vector.shape_cast %121 : vector<8x320xf32> to vector<1x8x320xf32>
    tpu.vector_store %arg8[%c0_138, %c0_139, %c0_140], %124 {strides = array<i32>} : memref<1x8x320xf32, #tpu.memory_space<vmem>>, vector<1x8x320xf32>,
    return
  }
  func.func @transform_0(%arg0: i32) -> (i32, i32, i32) {
    %c0_i32 = arith.constant 0 : i32
    %c0_i32_0 = arith.constant 0 : i32
    %c0_i32_1 = arith.constant 0 : i32
    return %arg0, %c0_i32, %c0_i32_0 : i32, i32, i32
  }
  func.func @transform_1(%arg0: i32) -> (i32, i32) {
    %c0_i32 = arith.constant 0 : i32
    %c0_i32_0 = arith.constant 0 : i32
    %c0_i32_1 = arith.constant 0 : i32
    return %c0_i32, %c0_i32_0 : i32, i32
  }
  func.func @transform_2(%arg0: i32) -> (i32, i32) {
    %c0_i32 = arith.constant 0 : i32
    %c0_i32_0 = arith.constant 0 : i32
    %c0_i32_1 = arith.constant 0 : i32
    return %c0_i32, %c0_i32_0 : i32, i32
  }
  func.func @transform_3(%arg0: i32) -> (i32, i32) {
    %c0_i32 = arith.constant 0 : i32
    %c0_i32_0 = arith.constant 0 : i32
    %c0_i32_1 = arith.constant 0 : i32
    return %c0_i32, %c0_i32_0 : i32, i32
  }
  func.func @transform_4(%arg0: i32) -> (i32, i32) {
    %c0_i32 = arith.constant 0 : i32
    %c0_i32_0 = arith.constant 0 : i32
    %c0_i32_1 = arith.constant 0 : i32
    return %c0_i32, %c0_i32_0 : i32, i32
  }
  func.func @transform_5(%arg0: i32) -> (i32, i32) {
    %c0_i32 = arith.constant 0 : i32
    %c0_i32_0 = arith.constant 0 : i32
    %c0_i32_1 = arith.constant 0 : i32
    return %c0_i32, %c0_i32_0 : i32, i32
  }
  func.func @transform_6(%arg0: i32) -> (i32, i32) {
    %c0_i32 = arith.constant 0 : i32
    %c0_i32_0 = arith.constant 0 : i32
    %c0_i32_1 = arith.constant 0 : i32
    return %c0_i32, %c0_i32_0 : i32, i32
  }
  func.func @transform_7(%arg0: i32) -> (i32, i32, i32) {
    %c0_i32 = arith.constant 0 : i32
    %c0_i32_0 = arith.constant 0 : i32
    %c0_i32_1 = arith.constant 0 : i32
    return %arg0, %c0_i32, %c0_i32_0 : i32, i32, i32
  }
}

</mosaic_0001>

<bundles_post_ra>
// kernel: basic_block_forward.1
= control target key start
LH: loop header
LB: loop body
LE: loop exit
PB: predicated region body
PF: predicated region fallthrough
CT: control target
= control target key end

     0   :  { %s1716_s24 = smov 0   ;;  %s2093_s0 = inlined_call_operand.vmem [shape: f32[2,8,512], index: 0, kind: input, shape index: {}]   ;;  %s2094_s1 = inlined_call_operand.vmem [shape: f32[8,72], index: 1, kind: input, shape index: {}]   ;;  %s2095_s2 = inlined_call_operand.vmem [shape: f32[8,1], index: 2, kind: input, shape index: {}]   ;;  %s2096_s3 = inlined_call_operand.vmem [shape: f32[8,72], index: 3, kind: input, shape index: {}]   ;;  %s2097_s4 = inlined_call_operand.vmem [shape: f32[8,1], index: 4, kind: input, shape index: {}]   ;;  %s2098_s5 = inlined_call_operand.vmem [shape: f32[8,72], index: 5, kind: input, shape index: {}]   ;;  %s2099_s6 = inlined_call_operand.vmem [shape: f32[8,1], index: 6, kind: input, shape index: {}]   ;;  %s2100_s7 = inlined_call_operand.vmem [shape: f32[2,8,320], index: 7, kind: output, shape index: {}]  }
   0x1 LB: > { %s1546_s25 = sadd.s32 4294967295, %s1658_s24   ;;  %p1550_p0 = scmp.ge.s32.totalorder %s1658_s24, 1  ;;  %s1658_s24 = sphi %s1716_s24, %s17_s24  }
   0x2   : > { %p237_p1 = scmp.lt.s32.totalorder %s1658_s24, 3 }
   0x4   : > { %p238_p2 = pnand %p1550_p0, %p237_p1 }
   0x5   : > { %p269_p3 = scmp.lt.s32.totalorder (!%p238_p2), %s1546_s25, 1  ;;  %s1660_s30 = smov (!%p238_p2), 86  }
   0x6   : > { %241 = sbr.rel (%p238_p2) target bundleno = 795 (0x31b), region = 48  ;;  %s1661_s8 = smov (!%p238_p2), 87  }
   0x7   : > { %s1662_s9 = smov (!%p238_p2), 88   ;;  %s1663_s10 = smov (!%p238_p2), 106  }
   0x8   : > { %s1664_s11 = smov (!%p238_p2), 107   ;;  %s1665_s12 = smov (!%p238_p2), 108  }
   0x9   : > { %s1666_s13 = smov (!%p238_p2), 126   ;;  %s1667_s14 = smov (!%p238_p2), 127  }
   0xa   : > { %s1670_s17 = smov (!%p238_p2), 65   ;;  %s1671_s18 = smov (!%p238_p2), 66  }
   0xb   : > { %s2132_s25 = smov (!%p269_p3, %s1546_s25), 1  ;;  %vm347_vm0 = vcmask 130048   ;;  %v1668_v4 = vmov 0.0   ;;  %v610_v5 = vld [vmem:[%s2095_s2] sm:$0xff]  ;;  %v1669_v6 = vmov 0   ;;  %s1672_s19 = smov 67  }
   0xc   : > { %s1562_s26 = sshll.u32 %s2132_s25, 5  ;;  %684 = vmatprep.mubr.f32.mxu0 %v1668_v4  ;;  %755 = vmatprep.mubr.f32.mxu1 %v1668_v4  ;;  %s1673_s20 = smov 85   ;;  %vm2108_vm1 = vcmask 703488   ;;  %vm2105_vm2 = vcmask 711680   ;;  %vm2107_vm3 = vcmask 719872   ;;  %vm2103_vm4 = vcmask 867328  }
   0xd   : > { %s273_s29 = scalar_lea.vmem %s2093_s0, %s1562_s26  ;;  %1650 = vset.pattern.permute.xlu0 %v1669_v6  ;;  %1651 = vset.pattern.permute.xlu1 %v1669_v6  ;;  %vm2106_vm5 = vcmask 875520   ;;  %vm2102_vm6 = vcmask 883712   ;;  %vm2104_vm7 = vcmask 1031168   ;;  %vm2101_vm8 = vcmask 1039360   ;;  %s1675_s23 = smov 105  }
   0xe   : > { %v1730_v0 = vld [vmem:[%s273_s29 + $0x8] sm:$0xff]  ;;  %v1732_v1 = vld [vmem:[%s273_s29] sm:$0xff]  ;;  %v1734_v2 = vld [vmem:[%s273_s29 + $0x10] sm:$0xff]  ;;  %vm616_vm9 = vcmask 588800   ;;  %vm779_vm10 = vcmask 523264   ;;  %vm1295_vm11 = vcmask 531456  }
   0xf   : > { %555 = vrot.lane.b32.xlu0 %v1730_v0, %s1660_s30  ;;  %553 = vrot.lane.b32.xlu1 %v1732_v1, %s1660_s30  ;;  %v548_v3 = vld [vmem:[%s273_s29 + $0x18] sm:$0xff]  ;;  %vm1274_vm12 = vcmask 539648   ;;  %vm1253_vm13 = vcmask 547840   ;;  %vm1232_vm14 = vcmask 695296  }
  0x10   : > { %348 = vst.msk [vmem:[#allocation2 + $0x18] sm:$0xff] %vm347_vm0, %v548_v3 }
  0x13   : > { %557 = vrot.lane.b32.xlu0 %v1734_v2, %s1660_s30  ;;  %527 = vrot.lane.b32.xlu1 %v1730_v0, %s1661_s8 }
  0x17   : > { %529 = vrot.lane.b32.xlu0 %v1734_v2, %s1661_s8  ;;  %525 = vrot.lane.b32.xlu1 %v1732_v1, %s1661_s8 }
  0x1b   : > { %559 = vrot.lane.b32.xlu0 %v548_v3, %s1660_s30  ;;  %499 = vrot.lane.b32.xlu1 %v1730_v0, %s1662_s9 }
  0x1f   : > { %501 = vrot.lane.b32.xlu0 %v1734_v2, %s1662_s9  ;;  %497 = vrot.lane.b32.xlu1 %v1732_v1, %s1662_s9 }
  0x23   : > { %531 = vrot.lane.b32.xlu0 %v548_v3, %s1661_s8  ;;  %471 = vrot.lane.b32.xlu1 %v1730_v0, %s1663_s10 }
  0x27   : > { %473 = vrot.lane.b32.xlu0 %v1734_v2, %s1663_s10  ;;  %469 = vrot.lane.b32.xlu1 %v1732_v1, %s1663_s10 }
  0x2b   : > { %503 = vrot.lane.b32.xlu0 %v548_v3, %s1662_s9  ;;  %443 = vrot.lane.b32.xlu1 %v1730_v0, %s1664_s11 }
  0x2f   : > { %445 = vrot.lane.b32.xlu0 %v1734_v2, %s1664_s11  ;;  %441 = vrot.lane.b32.xlu1 %v1732_v1, %s1664_s11 }
  0x33   : > { %475 = vrot.lane.b32.xlu0 %v548_v3, %s1663_s10  ;;  %415 = vrot.lane.b32.xlu1 %v1730_v0, %s1665_s12 }
  0x37   : > { %417 = vrot.lane.b32.xlu0 %v1734_v2, %s1665_s12  ;;  %413 = vrot.lane.b32.xlu1 %v1732_v1, %s1665_s12 }
  0x3b   : > { %447 = vrot.lane.b32.xlu0 %v548_v3, %s1664_s11  ;;  %387 = vrot.lane.b32.xlu1 %v1730_v0, %s1666_s13 }
  0x3f   : > { %389 = vrot.lane.b32.xlu0 %v1734_v2, %s1666_s13  ;;  %385 = vrot.lane.b32.xlu1 %v1732_v1, %s1666_s13 }
  0x43   : > { %419 = vrot.lane.b32.xlu0 %v548_v3, %s1665_s12  ;;  %359 = vrot.lane.b32.xlu1 %v1730_v0, %s1667_s14 }
  0x47   : > { %361 = vrot.lane.b32.xlu0 %v1734_v2, %s1667_s14  ;;  %357 = vrot.lane.b32.xlu1 %v1732_v1, %s1667_s14 }
  0x4b   : > { %391 = vrot.lane.b32.xlu0 %v548_v3, %s1666_s13  ;;  %363 = vrot.lane.b32.xlu1 %v548_v3, %s1667_s14  ;;  %v573_v3 = vld [vmem:[%s2094_s1] sm:$0xff] }
  0x4f   : > { %613 = vperm.xlu0 %1650, %v610_v5   ;;  %1293 = vrot.lane.b32.xlu1 %v1734_v2, %s1670_s17 }
  0x53   : > { %1291 = vrot.lane.b32.xlu0 %v1730_v0, %s1670_s17  ;;  %1270 = vrot.lane.b32.xlu1 %v1730_v0, %s1671_s18 }
  0x57   : > { %1289 = vrot.lane.b32.xlu0 %v1732_v1, %s1670_s17  ;;  %1268 = vrot.lane.b32.xlu1 %v1732_v1, %s1671_s18 }
  0x5b   : > { %1272 = vrot.lane.b32.xlu0 %v1734_v2, %s1671_s18  ;;  %1251 = vrot.lane.b32.xlu1 %v1734_v2, %s1672_s19 }
  0x5f   : > { %1249 = vrot.lane.b32.xlu0 %v1730_v0, %s1672_s19  ;;  %1228 = vrot.lane.b32.xlu1 %v1730_v0, %s1673_s20 }
  0x63   : > { %1247 = vrot.lane.b32.xlu0 %v1732_v1, %s1672_s19  ;;  %1226 = vrot.lane.b32.xlu1 %v1732_v1, %s1673_s20 }
  0x67   : > { %1230 = vrot.lane.b32.xlu0 %v1734_v2, %s1673_s20  ;;  %1210 = vrot.lane.b32.xlu1 %v1734_v2, %s1660_s30 }
  0x6b   : > { %1208 = vrot.lane.b32.xlu0 %v1730_v0, %s1660_s30  ;;  %1188 = vrot.lane.b32.xlu1 %v1730_v0, %s1661_s8 }
  0x6f   : > { %1206 = vrot.lane.b32.xlu0 %v1732_v1, %s1660_s30 }
  0x81   : > { %v556_v7 = vpop.permute.xlu0 %555  ;;  %v554_v8 = vpop.permute.xlu1 %553 }
  0x82   : > { %v562_v9 = vsel %vm2108_vm1, %v554_v8, %v556_v7 }
  0x85   : > { %v558_v10 = vpop.permute.xlu0 %557  ;;  %v528_v11 = vpop.permute.xlu1 %527 }
  0x86   : > { %v563_v12 = vsel %vm2108_vm1, %v556_v7, %v558_v10 }
  0x87   : > { %634 = vmatprep.subr.mxu0 %v563_v12  ;;  %v577_v12 = vld [vmem:[#allocation2 + $0x18] sm:$0xff] }
  0x88   : > { %635 = vmatpush1.msra.mxu0 %v562_v9 }
  0x89   : > { %v530_v13 = vpop.permute.xlu0 %529  ;;  %v526_v14 = vpop.permute.xlu1 %525 }
  0x8a   : > { %v535_v15 = vsel %vm2105_vm2, %v528_v11, %v530_v13  ;;  %v534_v16 = vsel %vm2105_vm2, %v526_v14, %v528_v11  ;;  %v279_v14 = vlaneseq }
  0x8b   : > { %636 = vmatprep.subr.mxu0 %v535_v15 }
  0x8c   : > { %637 = vmatpush1.msra.mxu0 %v534_v16 }
  0x8d   : > { %v560_v17 = vpop.permute.xlu0 %559  ;;  %v500_v18 = vpop.permute.xlu1 %499 }
  0x8e   : > { %v564_v19 = vsel %vm2108_vm1, %v558_v10, %v560_v17  ;;  %572 = vst.msk [vmem:[#allocation2 + $0x118] sm:$0xff] %vm347_vm0, %v560_v17 }
  0x91   : > { %v502_v20 = vpop.permute.xlu0 %501  ;;  %v498_v21 = vpop.permute.xlu1 %497 }
  0x92   : > { %v507_v22 = vsel %vm2107_vm3, %v500_v18, %v502_v20  ;;  %v506_v23 = vsel %vm2107_vm3, %v498_v21, %v500_v18  ;;  %v280_v18 = vand.u32 127, %v279_v14 }
  0x93   : > { %638 = vmatprep.subr.mxu0 %v507_v22 }
  0x94   : > { %639 = vmatpush1.msra.mxu0 %v506_v23  ;;  %v281_v22 = vadd.s32 128, %v280_v18 }
  0x95   : > { %v532_v24 = vpop.permute.xlu0 %531  ;;  %v472_v25 = vpop.permute.xlu1 %471  ;;  %v609_v26 = vld [vmem:[#allocation2 + $0x118] sm:$0xff] }
  0x96   : > { %v536_v27 = vsel %vm2105_vm2, %v530_v13, %v532_v24  ;;  %544 = vst.msk [vmem:[#allocation2 + $0xf8] sm:$0xff] %vm347_vm0, %v532_v24  ;;  %705 = vmatprep.subr.mxu1 %v609_v26 }
  0x97   : > { %706 = vmatpush1.msra.mxu1 %v564_v19 }
  0x99   : > { %v474_v28 = vpop.permute.xlu0 %473  ;;  %v470_v29 = vpop.permute.xlu1 %469 }
  0x9a   : > { %v479_v30 = vsel %vm2103_vm4, %v472_v25, %v474_v28  ;;  %v478_v31 = vsel %vm2103_vm4, %v470_v29, %v472_v25  ;;  %v284_v25 = vcvt.s32.f32 %v280_v18 }
  0x9b   : > { %640 = vmatprep.subr.mxu0 %v479_v30 }
  0x9c   : > { %641 = vmatpush1.msra.mxu0 %v478_v31  ;;  %v288_v31 = vadd.f32 0.5, %v284_v25 }
  0x9d   : > { %v504_v32 = vpop.permute.xlu0 %503  ;;  %v444_v33 = vpop.permute.xlu1 %443  ;;  %v605_v34 = vld [vmem:[#allocation2 + $0xf8] sm:$0xff] }
  0x9e   : > { %v508_v35 = vsel %vm2107_vm3, %v502_v20, %v504_v32  ;;  %516 = vst.msk [vmem:[#allocation2 + $0xd8] sm:$0xff] %vm347_vm0, %v504_v32  ;;  %707 = vmatprep.subr.mxu1 %v605_v34 }
  0x9f   : > { %708 = vmatpush1.msra.mxu1 %v536_v27 }
  0xa1   : > { %v446_v36 = vpop.permute.xlu0 %445  ;;  %v442_v37 = vpop.permute.xlu1 %441 }
  0xa2   : > { %v451_v38 = vsel %vm2106_vm5, %v444_v33, %v446_v36  ;;  %v450_v39 = vsel %vm2106_vm5, %v442_v37, %v444_v33 }
  0xa3   : > { %642 = vmatprep.subr.mxu0 %v451_v38  ;;  %v282_v38 = vadd.s32 256, %v280_v18 }
  0xa4   : > { %643 = vmatpush1.msra.mxu0 %v450_v39 }
  0xa5   : > { %v476_v40 = vpop.permute.xlu0 %475  ;;  %v416_v41 = vpop.permute.xlu1 %415  ;;  %v601_v42 = vld [vmem:[#allocation2 + $0xd8] sm:$0xff] }
  0xa6   : > { %v480_v43 = vsel %vm2103_vm4, %v474_v28, %v476_v40  ;;  %488 = vst.msk [vmem:[#allocation2 + $0xb8] sm:$0xff] %vm347_vm0, %v476_v40  ;;  %709 = vmatprep.subr.mxu1 %v601_v42  ;;  %v285_v28 = vcvt.s32.f32 %v281_v22 }
  0xa7   : > { %710 = vmatpush1.msra.mxu1 %v508_v35 }
  0xa8   : > { %v289_v33 = vadd.f32 0.5, %v285_v28 }
  0xa9   : > { %v418_v44 = vpop.permute.xlu0 %417  ;;  %v414_v45 = vpop.permute.xlu1 %413 }
  0xaa   : > { %v423_v46 = vsel %vm2102_vm6, %v416_v41, %v418_v44  ;;  %v422_v47 = vsel %vm2102_vm6, %v414_v45, %v416_v41  ;;  %v293_v39 = vmul.f32 0.05, %v289_v33  ;;  %v286_v45 = vcvt.s32.f32 %v282_v38 }
  0xab   : > { %644 = vmatprep.subr.mxu0 %v423_v46 }
  0xac   : > { %645 = vmatpush1.msra.mxu0 %v422_v47  ;;  %v297_v46 = vfloor.f32 %v293_v39 }
  0xad   : > { %v448_v48 = vpop.permute.xlu0 %447  ;;  %v388_v49 = vpop.permute.xlu1 %387  ;;  %v597_v50 = vld [vmem:[#allocation2 + $0xb8] sm:$0xff] }
  0xae   : > { %v452_v51 = vsel %vm2106_vm5, %v446_v36, %v448_v48  ;;  %460 = vst.msk [vmem:[#allocation2 + $0x98] sm:$0xff] %vm347_vm0, %v448_v48  ;;  %711 = vmatprep.subr.mxu1 %v597_v50  ;;  %v292_v36 = vmul.f32 0.05, %v288_v31 }
  0xaf   : > { %712 = vmatpush1.msra.mxu1 %v480_v43 }
  0xb0   : > { %v296_v42 = vfloor.f32 %v292_v36 }
  0xb1   : > { %v390_v52 = vpop.permute.xlu0 %389  ;;  %v386_v53 = vpop.permute.xlu1 %385 }
  0xb2   : > { %v395_v54 = vsel %vm2104_vm7, %v388_v49, %v390_v52  ;;  %v394_v55 = vsel %vm2104_vm7, %v386_v53, %v388_v49  ;;  %v300_v49 = vmul.f32 20.0, %v296_v42  ;;  %vm308_vm15 = vcmp.ge.f32.partialorder %v296_v42, 1.0 }
  0xb3   : > { %646 = vmatprep.subr.mxu0 %v395_v54 }
  0xb4   : > { %647 = vmatpush1.msra.mxu0 %v394_v55  ;;  %v304_v54 = vsub.f32 %v284_v25, %v300_v49 }
  0xb5   : > { %v420_v56 = vpop.permute.xlu0 %419  ;;  %v360_v57 = vpop.permute.xlu1 %359  ;;  %v593_v58 = vld [vmem:[#allocation2 + $0x98] sm:$0xff] }
  0xb6   : > { %v424_v59 = vsel %vm2102_vm6, %v418_v44, %v420_v56  ;;  %432 = vst.msk [vmem:[#allocation2 + $0x78] sm:$0xff] %vm347_vm0, %v420_v56  ;;  %713 = vmatprep.subr.mxu1 %v593_v58 }
  0xb7   : > { %714 = vmatpush1.msra.mxu1 %v452_v51  ;;  %v290_v51 = vadd.f32 0.5, %v286_v45 }
  0xb9   : > { %v362_v60 = vpop.permute.xlu0 %361  ;;  %v358_v61 = vpop.permute.xlu1 %357  ;;  %v294_v56 = vmul.f32 0.05, %v290_v51 }
  0xba   : > { %v367_v62 = vsel %vm2101_vm8, %v360_v57, %v362_v60  ;;  %v366_v63 = vsel %vm2101_vm8, %v358_v61, %v360_v57 }
  0xbb   : > { %648 = vmatprep.subr.mxu0 %v367_v62  ;;  %v298_v58 = vfloor.f32 %v294_v56 }
  0xbc   : > { %649 = vmatpush1.msra.mxu0 %v366_v63 }
  0xbd   : > { %v392_v5 = vpop.permute.xlu0 %391  ;;  %v364_v6 = vpop.permute.xlu1 %363  ;;  %v589_v7 = vld [vmem:[#allocation2 + $0x78] sm:$0xff]  ;;  %650 = vmatprep.subr.mxu0 %v1730_v0 }
  0xbe   : > { %v396_v8 = vsel %vm2104_vm7, %v390_v52, %v392_v5  ;;  %404 = vst.msk [vmem:[#allocation2 + $0x58] sm:$0xff] %vm347_vm0, %v392_v5  ;;  %v368_v9 = vsel %vm2101_vm8, %v362_v60, %v364_v6  ;;  %376 = vst.msk [vmem:[#allocation2 + $0x38] sm:$0xff] %vm347_vm0, %v364_v6  ;;  %715 = vmatprep.subr.mxu1 %v589_v7  ;;  %651 = vmatpush1.msra.mxu0 %v1732_v1  ;;  %v301_v52 = vmul.f32 20.0, %v297_v46 }
  0xbf   : > { %716 = vmatpush1.msra.mxu1 %v424_v59  ;;  %1554 = vmatmul.mubr.msk.f32.vlgmr.msra.gmra.mxu0 %vm616_vm9, %v573_v3  ;;  %vm312_vm0 = vcmp.lt.f32.partialorder %v296_v42, 17.0  ;;  %vm328_vm7 = vcmp.lt.f32.partialorder %v304_v54, 17.0  ;;  %v302_v59 = vmul.f32 20.0, %v298_v58 }
  0xc0   : > { %1042 = vmatprep.mubr.f32.mxu0 %v1668_v4  ;;  %v305_v57 = vsub.f32 %v285_v28, %v301_v52 }
  0xc1   : > { %v1294_v16 = vpop.permute.xlu1 %1293 }
  0xc2   : > { %1303 = vst.msk [vmem:[#allocation4 + $0xd0] sm:$0xff] %vm779_vm10, %v1294_v16  ;;  %vm321_vm6 = vcmp.ge.f32.partialorder %v305_v57, 1.0  ;;  %vm329_vm5 = vcmp.lt.f32.partialorder %v305_v57, 17.0 }
  0xc5   : > { %v585_v10 = vld [vmem:[#allocation2 + $0x58] sm:$0xff]  ;;  %v1271_v20 = vpop.permute.xlu1 %1270 }
  0xc6   : > { %v581_v11 = vld [vmem:[#allocation2 + $0x38] sm:$0xff]  ;;  %717 = vmatprep.subr.mxu1 %v585_v10 }
  0xc7   : > { %718 = vmatpush1.msra.mxu1 %v396_v8 }
  0xc8   : > { %719 = vmatprep.subr.mxu1 %v581_v11 }
  0xc9   : > { %720 = vmatpush1.msra.mxu1 %v368_v9  ;;  %v1269_v24 = vpop.permute.xlu1 %1268  ;;  %v1331_v49 = vld [vmem:[#allocation4 + $0xd0] sm:$0xff] }
  0xca   : > { %721 = vmatprep.subr.mxu1 %v577_v12  ;;  %v1860_v13 = vpop.permute.xlu0 %613  ;;  %v1870_v27 = vsel %vm1274_vm12, %v1269_v24, %v1271_v20 }
  0xcb   : > { %722 = vmatpush1.msra.mxu1 %v1734_v2 }
  0xcc   : > { %1555 = vmatmul.mubr.msk.f32.vlgmr.msra.gmra.mxu1 %vm616_vm9, %v573_v3  ;;  %1583 = vmatprep.subr.mxu1 %v1668_v4  ;;  %v306_v3 = vsub.f32 %v286_v45, %v302_v59  ;;  %v2011_v45 = vld [vmem:[%s2096_s3] sm:$0xff] }
  0xcd   : > { %v1252_v30 = vpop.permute.xlu1 %1251 }
  0xce   : > { %v1292_v15 = vpop.permute.xlu0 %1291  ;;  %1261 = vst.msk [vmem:[#allocation4 + $0xa0] sm:$0xff] %vm779_vm10, %v1252_v30 }
  0xcf   : > { %v1862_v17 = vsel %vm1295_vm11, %v1292_v15, %v1294_v16 }
  0xd1   : > { %v1229_v35 = vpop.permute.xlu1 %1228 }
  0xd2   : > { %v1290_v19 = vpop.permute.xlu0 %1289 }
  0xd3   : > { %v1865_v21 = vsel %vm1295_vm11, %v1290_v19, %v1292_v15  ;;  %vm309_vm11 = vcmp.ge.f32.partialorder %v297_v46, 1.0  ;;  %v969_v19 = vld [vmem:[%s2097_s4] sm:$0xff] }
  0xd5   : > { %v1227_v41 = vpop.permute.xlu1 %1226 }
  0xd6   : > { %v1273_v23 = vpop.permute.xlu0 %1272  ;;  %v1880_v44 = vsel %vm1232_vm14, %v1227_v41, %v1229_v35 }
  0xd7   : > { %v1867_v26 = vsel %vm1274_vm12, %v1271_v20, %v1273_v23  ;;  %1282 = vst.msk [vmem:[#allocation4 + $0xb8] sm:$0xff] %vm779_vm10, %v1273_v23  ;;  %vm313_vm12 = vcmp.lt.f32.partialorder %v297_v46, 17.0 }
  0xd8   : > { %vm317_vm8 = vmand %vm309_vm11, %vm313_vm12  ;;  %vm2111_vm11 = vcmask 703488  }
  0xd9   : > { %v1211_v48 = vpop.permute.xlu1 %1210  ;;  %vm325_vm2 = vmand %vm317_vm8, %vm321_vm6 }
  0xda   : > { %v1250_v29 = vpop.permute.xlu0 %1249  ;;  %1219 = vst.msk [vmem:[#allocation4 + $0x70] sm:$0xff] %vm779_vm10, %v1211_v48  ;;  %vm2112_vm12 = vmmov %vm2111_vm11 }
  0xdb   : > { %v1872_v32 = vsel %vm1253_vm13, %v1250_v29, %v1252_v30 }
  0xde   : > { %v1248_v34 = vpop.permute.xlu0 %1247 }
  0xdf   : > { %v1875_v37 = vsel %vm1253_vm13, %v1248_v34, %v1250_v29  ;;  %vm316_vm13 = vmand %vm308_vm15, %vm312_vm0  ;;  %vm310_vm15 = vcmp.ge.f32.partialorder %v298_v58, 1.0  ;;  %vm314_vm0 = vcmp.lt.f32.partialorder %v298_v58, 17.0 }
  0xe0   : > { %vm318_vm6 = vmand %vm310_vm15, %vm314_vm0  ;;  %vm2115_vm15 = vcmask 711680  }
  0xe1   : > { %vm2116_vm0 = vmmov %vm2115_vm15 }
  0xe2   : > { %v1231_v40 = vpop.permute.xlu0 %1230 }
  0xe3   : > { %v1877_v43 = vsel %vm1232_vm14, %v1229_v35, %v1231_v40  ;;  %1240 = vst.msk [vmem:[#allocation4 + $0x88] sm:$0xff] %vm779_vm10, %v1231_v40  ;;  %vm320_vm14 = vcmp.ge.f32.partialorder %v304_v54, 1.0  ;;  %v1325_v54 = vld [vmem:[#allocation4 + $0xa0] sm:$0xff] }
  0xe4   : > { %vm324_vm4 = vmand %vm316_vm13, %vm320_vm14  ;;  %vm2113_vm13 = vcmask 875520  }
  0xe5   : > { %vm332_vm3 = vmand %vm324_vm4, %vm328_vm7  ;;  %vm322_vm4 = vcmp.ge.f32.partialorder %v306_v3, 1.0 }
  0xe6   : > { %v1209_v47 = vpop.permute.xlu0 %1208  ;;  %v336_v62 = vsel %vm332_vm3, 1.0, %v1668_v4  ;;  %vm326_vm7 = vmand %vm318_vm6, %vm322_vm4  ;;  %vm2109_vm3 = vcmask 719872   ;;  %vm2117_vm6 = vcmask 1031168  }
  0xe7   : > { %v1883_v50 = vsel %vm2108_vm1, %v1209_v47, %v1211_v48  ;;  %vm2110_vm8 = vmmov %vm2109_vm3 }
  0xe8   : > { %vm2114_vm14 = vmmov %vm2113_vm13 }
  0xe9   : > { %vm2118_vm4 = vmmov %vm2117_vm6 }
  0xea   : > { %v1207_v53 = vpop.permute.xlu0 %1206  ;;  %v1322_v58 = vld [vmem:[#allocation4 + $0x88] sm:$0xff] }
  0xeb   : > { %v1887_v55 = vsel %vm2108_vm1, %v1207_v53, %v1209_v47  ;;  %vm333_vm1 = vmand %vm325_vm2, %vm329_vm5  ;;  %vm330_vm2 = vcmp.lt.f32.partialorder %v306_v3, 17.0  ;;  %v1328_v53 = vld [vmem:[#allocation4 + $0xb8] sm:$0xff] }
  0xec   : > { %v337_v7 = vsel %vm333_vm1, 1.0, %v1668_v4  ;;  %vm334_vm5 = vmand %vm326_vm7, %vm330_vm2  ;;  %vm1674_vm1 = vmmov 0   ;;  %vm2119_vm7 = vcmask 867328  }
  0xed   : > { %v338_v14 = vsel %vm334_vm5, 1.0, %v1668_v4  ;;  %1601 = vmatprep.mubr.msk.f32.mxu1 %vm1674_vm1, %v1668_v4  ;;  %vm2120_vm2 = vmmov %vm2119_vm7 }
  0xee   : > { %vm2121_vm5 = vmmov %vm2116_vm0 }
 0x17f   : > { %v686_v60 = vpop.f32.mrf.mxu0 }
 0x180   : > { %v687_v61 = vadd.f32 %v686_v60, %v1860_v13 }
 0x181   : > { %v688_v63 = vpop.f32.mrf.mxu0 }
 0x182   : > { %v762_v5 = vmax.f32 %v687_v61, 0.0  ;;  %v689_v6 = vadd.f32 %v688_v63, %v1860_v13  ;;  %v1319_v63 = vld [vmem:[#allocation4 + $0x70] sm:$0xff] }
 0x184   : > { %v1893_v8 = vmul.f32 %v762_v5, %v336_v62  ;;  %v763_v9 = vmax.f32 %v689_v6, 0.0 }
 0x186   : > { %v1895_v10 = vmul.f32 %v763_v9, %v337_v7 }
 0x18c   : > { %v757_v11 = vpop.f32.mrf.mxu1 }
 0x18d   : > { %v758_v12 = vadd.f32 %v757_v11, %v1860_v13  ;;  %v1332_v13 = vld [vmem:[%s2099_s6] sm:$0xff] }
 0x18e   : > { %v759_v15 = vpop.f32.mrf.mxu1 }
 0x18f   : > { %v764_v16 = vmax.f32 %v758_v12, 0.0 }
 0x191   : > { %v768_v18 = vmul.f32 %v764_v16, %v338_v14 }
 0x193   : > { %931 = vrot.lane.b32.xlu1 %v768_v18, %s1660_s30  ;;  %911 = vrot.lane.b32.xlu0 %v768_v18, %s1661_s8  ;;  %780 = vst.msk [vmem:[#allocation3 + $0x10] sm:$0xff] %vm779_vm10, %v768_v18 }
 0x197   : > { %891 = vrot.lane.b32.xlu1 %v768_v18, %s1662_s9  ;;  %871 = vrot.lane.b32.xlu0 %v768_v18, %s1663_s10 }
 0x19a   : > { %v944_v48 = vld [vmem:[#allocation3 + $0x10] sm:$0xff] }
 0x19b   : > { %851 = vrot.lane.b32.xlu1 %v768_v18, %s1664_s11  ;;  %831 = vrot.lane.b32.xlu0 %v768_v18, %s1665_s12 }
 0x19f   : > { %811 = vrot.lane.b32.xlu1 %v768_v18, %s1666_s13  ;;  %791 = vrot.lane.b32.xlu0 %v768_v18, %s1667_s14 }
 0x1a3   : > { %927 = vrot.lane.b32.xlu0 %v1893_v8, %s1660_s30  ;;  %907 = vrot.lane.b32.xlu1 %v1893_v8, %s1661_s8 }
 0x1a7   : > { %887 = vrot.lane.b32.xlu0 %v1893_v8, %s1662_s9  ;;  %867 = vrot.lane.b32.xlu1 %v1893_v8, %s1663_s10 }
 0x1ab   : > { %847 = vrot.lane.b32.xlu0 %v1893_v8, %s1664_s11  ;;  %827 = vrot.lane.b32.xlu1 %v1893_v8, %s1665_s12 }
 0x1af   : > { %807 = vrot.lane.b32.xlu0 %v1893_v8, %s1666_s13  ;;  %787 = vrot.lane.b32.xlu1 %v1893_v8, %s1667_s14 }
 0x1b3   : > { %889 = vrot.lane.b32.xlu0 %v1895_v10, %s1662_s9  ;;  %929 = vrot.lane.b32.xlu1 %v1895_v10, %s1660_s30 }
 0x1b7   : > { %849 = vrot.lane.b32.xlu0 %v1895_v10, %s1664_s11  ;;  %909 = vrot.lane.b32.xlu1 %v1895_v10, %s1661_s8 }
 0x1bb   : > { %809 = vrot.lane.b32.xlu0 %v1895_v10, %s1666_s13  ;;  %869 = vrot.lane.b32.xlu1 %v1895_v10, %s1663_s10 }
 0x1bf   : > { %1190 = vrot.lane.b32.xlu0 %v1734_v2, %s1661_s8  ;;  %829 = vrot.lane.b32.xlu1 %v1895_v10, %s1665_s12 }
 0x1c3   : > { %1167 = vrot.lane.b32.xlu0 %v1730_v0, %s1675_s23  ;;  %789 = vrot.lane.b32.xlu1 %v1895_v10, %s1667_s14 }
 0x1c7   : > { %1165 = vrot.lane.b32.xlu0 %v1732_v1, %s1675_s23  ;;  %1186 = vrot.lane.b32.xlu1 %v1732_v1, %s1661_s8 }
 0x1cb   : > { %1149 = vrot.lane.b32.xlu0 %v1734_v2, %s1663_s10  ;;  %1169 = vrot.lane.b32.xlu1 %v1734_v2, %s1675_s23 }
 0x1cf   : > { %1127 = vrot.lane.b32.xlu0 %v1730_v0, %s1664_s11  ;;  %1147 = vrot.lane.b32.xlu1 %v1730_v0, %s1663_s10  ;;  %v1967_v0 = vpop.permute.xlu1 %1188 }
 0x1d3   : > { %1125 = vrot.lane.b32.xlu0 %v1732_v1, %s1664_s11  ;;  %1145 = vrot.lane.b32.xlu1 %v1732_v1, %s1663_s10 }
 0x1d7   : > { %1335 = vperm.xlu0 %1650, %v1332_v13   ;;  %1129 = vrot.lane.b32.xlu1 %v1734_v2, %s1664_s11  ;;  %s1625_s11 = smul.u32 24, %s2132_s25 }
 0x1d9   : > { %s278_s14 = scalar_lea.vmem %s2100_s7, %s1625_s11 }
 0x1db   : > { %972 = vperm.xlu1 %1651, %v969_v19  }
 0x205   : > { %v1969_v20 = vpop.permute.xlu1 %931  ;;  %v1971_v22 = vpop.permute.xlu0 %911 }
 0x206   : > { %940 = vst.msk [vmem:[#allocation3 + $0xd0] sm:$0xff] %vm779_vm10, %v1969_v20  ;;  %920 = vst.msk [vmem:[#allocation3 + $0xb8] sm:$0xff] %vm779_vm10, %v1971_v22 }
 0x209   : > { %v1977_v1 = vpop.permute.xlu1 %891  ;;  %v1979_v2 = vpop.permute.xlu0 %871 }
 0x20a   : > { %900 = vst.msk [vmem:[#allocation3 + $0xa0] sm:$0xff] %vm779_vm10, %v1977_v1  ;;  %880 = vst.msk [vmem:[#allocation3 + $0x88] sm:$0xff] %vm779_vm10, %v1979_v2 }
 0x20d   : > { %v1985_v23 = vpop.permute.xlu1 %851  ;;  %v1987_v24 = vpop.permute.xlu0 %831  ;;  %v968_v25 = vld [vmem:[#allocation3 + $0xd0] sm:$0xff]  ;;  %v965_v28 = vld [vmem:[#allocation3 + $0xb8] sm:$0xff] }
 0x20e   : > { %860 = vst.msk [vmem:[#allocation3 + $0x70] sm:$0xff] %vm779_vm10, %v1985_v23  ;;  %840 = vst.msk [vmem:[#allocation3 + $0x58] sm:$0xff] %vm779_vm10, %v1987_v24  ;;  %1584 = vmatpush3.msra.mxu1 %v968_v25 }
 0x20f   : > { %1585 = vmatprep.subr.mxu1 %v1668_v4 }
 0x210   : > { %1586 = vmatpush3.msra.mxu1 %v965_v28 }
 0x211   : > { %1587 = vmatprep.subr.mxu1 %v1668_v4  ;;  %v1995_v29 = vpop.permute.xlu1 %811  ;;  %v1997_v30 = vpop.permute.xlu0 %791  ;;  %v962_v31 = vld [vmem:[#allocation3 + $0xa0] sm:$0xff]  ;;  %v959_v33 = vld [vmem:[#allocation3 + $0x88] sm:$0xff] }
 0x212   : > { %820 = vst.msk [vmem:[#allocation3 + $0x40] sm:$0xff] %vm779_vm10, %v1995_v29  ;;  %800 = vst.msk [vmem:[#allocation3 + $0x28] sm:$0xff] %vm779_vm10, %v1997_v30  ;;  %1588 = vmatpush3.msra.mxu1 %v962_v31 }
 0x213   : > { %1589 = vmatprep.subr.mxu1 %v1668_v4 }
 0x214   : > { %1590 = vmatpush3.msra.mxu1 %v959_v33 }
 0x215   : > { %1591 = vmatprep.subr.mxu1 %v1668_v4  ;;  %v928_v34 = vpop.permute.xlu0 %927  ;;  %v908_v35 = vpop.permute.xlu1 %907  ;;  %v956_v36 = vld [vmem:[#allocation3 + $0x70] sm:$0xff]  ;;  %v953_v38 = vld [vmem:[#allocation3 + $0x58] sm:$0xff] }
 0x216   : > { %1592 = vmatpush3.msra.mxu1 %v956_v36 }
 0x217   : > { %1593 = vmatprep.subr.mxu1 %v1668_v4 }
 0x218   : > { %1594 = vmatpush3.msra.mxu1 %v953_v38 }
 0x219   : > { %1595 = vmatprep.subr.mxu1 %v1668_v4  ;;  %v888_v39 = vpop.permute.xlu0 %887  ;;  %v868_v40 = vpop.permute.xlu1 %867  ;;  %v950_v41 = vld [vmem:[#allocation3 + $0x40] sm:$0xff]  ;;  %v947_v42 = vld [vmem:[#allocation3 + $0x28] sm:$0xff] }
 0x21a   : > { %1596 = vmatpush3.msra.mxu1 %v950_v41 }
 0x21b   : > { %1597 = vmatprep.subr.mxu1 %v1668_v4 }
 0x21c   : > { %1598 = vmatpush3.msra.mxu1 %v947_v42 }
 0x21d   : > { %1599 = vmatprep.subr.mxu1 %v1668_v4  ;;  %v848_v46 = vpop.permute.xlu0 %847  ;;  %v828_v47 = vpop.permute.xlu1 %827 }
 0x21e   : > { %1600 = vmatpush3.msra.mxu1 %v944_v48 }
 0x21f   : > { %1604 = vmatprep.subr.mxu1 %v1668_v4  ;;  %1602 = vmatmul.mubr.msk.f32.vlgmr.msra.gmra.mxu1 %vm616_vm9, %v2011_v45 }
 0x220   : > { %1605 = vmatpush3.msra.mxu1 %v1331_v49  ;;  %1622 = vmatprep.mubr.msk.f32.mxu1 %vm1674_vm1, %v1668_v4  ;;  %vm2122_vm1 = vcmask 883712  }
 0x221   : > { %1606 = vmatprep.subr.mxu1 %v1668_v4  ;;  %v808_v51 = vpop.permute.xlu0 %807  ;;  %v788_v52 = vpop.permute.xlu1 %787 }
 0x222   : > { %1607 = vmatpush3.msra.mxu1 %v1328_v53 }
 0x223   : > { %1608 = vmatprep.subr.mxu1 %v1668_v4 }
 0x224   : > { %1609 = vmatpush3.msra.mxu1 %v1325_v54 }
 0x225   : > { %1610 = vmatprep.subr.mxu1 %v1668_v4  ;;  %v890_v56 = vpop.permute.xlu0 %889  ;;  %v930_v57 = vpop.permute.xlu1 %929 }
 0x226   : > { %v893_v59 = vsel %vm2109_vm3, %v888_v39, %v890_v56  ;;  %v894_v60 = vsel %vm2110_vm8, %v890_v56, %v1977_v1  ;;  %v933_v61 = vsel %vm2111_vm11, %v928_v34, %v930_v57  ;;  %v934_v62 = vsel %vm2112_vm12, %v930_v57, %v1969_v20  ;;  %1611 = vmatpush3.msra.mxu1 %v1322_v58  ;;  %vm2123_vm3 = vmmov %vm2122_vm1 }
 0x227   : > { %1612 = vmatprep.subr.mxu1 %v1668_v4  ;;  %992 = vmatprep.subr.mxu0 %v934_v62  ;;  %vm2124_vm8 = vcmask 1039360   ;;  %vm1171_vm12 = vcmask 859136  }
 0x228   : > { %1613 = vmatpush3.msra.mxu1 %v1319_v63  ;;  %993 = vmatpush1.msra.mxu0 %v933_v61  ;;  %vm2125_vm11 = vmmov %vm2124_vm8 }
 0x229   : > { %v850_v3 = vpop.permute.xlu0 %849  ;;  %v910_v5 = vpop.permute.xlu1 %909  ;;  %1614 = vmatprep.subr.mxu1 %v1668_v4 }
 0x22a   : > { %v853_v6 = vsel %vm2113_vm13, %v848_v46, %v850_v3  ;;  %v854_v7 = vsel %vm2114_vm14, %v850_v3, %v1985_v23  ;;  %v913_v9 = vsel %vm2115_vm15, %v908_v35, %v910_v5  ;;  %v914_v11 = vsel %vm2116_vm0, %v910_v5, %v1971_v22  ;;  %vm2126_vm13 = vmmov %vm2116_vm0 }
 0x22b   : > { %994 = vmatprep.subr.mxu0 %v914_v11  ;;  %vm2127_vm14 = vmmov %vm2120_vm2  ;;  %vm2129_vm0 = vcmask 875520  }
 0x22c   : > { %995 = vmatpush1.msra.mxu0 %v913_v9  ;;  %vm2128_vm15 = vmmov %vm2120_vm2 }
 0x22d   : > { %v810_v12 = vpop.permute.xlu0 %809  ;;  %v870_v14 = vpop.permute.xlu1 %869  ;;  %996 = vmatprep.subr.mxu0 %v894_v60 }
 0x22e   : > { %v813_v15 = vsel %vm2117_vm6, %v808_v51, %v810_v12  ;;  %v814_v16 = vsel %vm2118_vm4, %v810_v12, %v1995_v29  ;;  %v873_v18 = vsel %vm2119_vm7, %v868_v40, %v870_v14  ;;  %v874_v13 = vsel %vm2120_vm2, %v870_v14, %v1979_v2  ;;  %997 = vmatpush1.msra.mxu0 %v893_v59  ;;  %vm2130_vm6 = vmmov %vm2129_vm0 }
 0x22f   : > { %998 = vmatprep.subr.mxu0 %v874_v13 }
 0x230   : > { %999 = vmatpush1.msra.mxu0 %v873_v18 }
 0x231   : > { %v1191_v19 = vpop.permute.xlu0 %1190  ;;  %v830_v20 = vpop.permute.xlu1 %829  ;;  %1000 = vmatprep.subr.mxu0 %v854_v7 }
 0x232   : > { %v1193_v22 = vsel %vm2121_vm5, %v1967_v0, %v1191_v19  ;;  %1199 = vst.msk [vmem:[#allocation4 + $0x58] sm:$0xff] %vm779_vm10, %v1191_v19  ;;  %v833_v1 = vsel %vm2122_vm1, %v828_v47, %v830_v20  ;;  %v834_v23 = vsel %vm2123_vm3, %v830_v20, %v1987_v24  ;;  %1001 = vmatpush1.msra.mxu0 %v853_v6 }
 0x233   : > { %1002 = vmatprep.subr.mxu0 %v834_v23 }
 0x234   : > { %1003 = vmatpush1.msra.mxu0 %v833_v1 }
 0x235   : > { %v790_v2 = vpop.permute.xlu1 %789  ;;  %v1168_v25 = vpop.permute.xlu0 %1167  ;;  %1004 = vmatprep.subr.mxu0 %v814_v16 }
 0x236   : > { %v793_v28 = vsel %vm2124_vm8, %v788_v52, %v790_v2  ;;  %v794_v29 = vsel %vm2125_vm11, %v790_v2, %v1997_v30  ;;  %1005 = vmatpush1.msra.mxu0 %v813_v15 }
 0x237   : > { %1006 = vmatprep.subr.mxu0 %v794_v29 }
 0x238   : > { %1007 = vmatpush1.msra.mxu0 %v793_v28 }
 0x239   : > { %v1187_v31 = vpop.permute.xlu1 %1186  ;;  %v1166_v33 = vpop.permute.xlu0 %1165  ;;  %v1316_v34 = vld [vmem:[#allocation4 + $0x58] sm:$0xff]  ;;  %1008 = vmatprep.subr.mxu0 %v1895_v10 }
 0x23a   : > { %v1192_v24 = vsel %vm2126_vm13, %v1187_v31, %v1967_v0  ;;  %v1172_v35 = vsel %vm1171_vm12, %v1166_v33, %v1168_v25  ;;  %1615 = vmatpush3.msra.mxu1 %v1316_v34  ;;  %1009 = vmatpush1.msra.mxu0 %v1893_v8 }
 0x23b   : > { %1556 = vmatmul.mubr.msk.f32.vlgmr.msra.gmra.mxu0 %vm616_vm9, %v2011_v45  ;;  %1355 = vmatprep.subr.mxu0 %v1862_v17 }
 0x23c   : > { %1356 = vmatpush1.msra.mxu0 %v1865_v21  ;;  %1616 = vmatprep.subr.mxu1 %v1668_v4 }
 0x23d   : > { %v1170_v30 = vpop.permute.xlu1 %1169  ;;  %v1150_v36 = vpop.permute.xlu0 %1149  ;;  %1357 = vmatprep.subr.mxu0 %v1867_v26  ;;  %1405 = vmatprep.mubr.f32.mxu0 %v1668_v4 }
 0x23e   : > { %v1173_v10 = vsel %vm1171_vm12, %v1168_v25, %v1170_v30  ;;  %1179 = vst.msk [vmem:[#allocation4 + $0x40] sm:$0xff] %vm779_vm10, %v1170_v30  ;;  %1158 = vst.msk [vmem:[#allocation4 + $0x28] sm:$0xff] %vm779_vm10, %v1150_v36  ;;  %1358 = vmatpush1.msra.mxu0 %v1870_v27 }
 0x23f   : > { %1359 = vmatprep.subr.mxu0 %v1872_v32 }
 0x240   : > { %1360 = vmatpush1.msra.mxu0 %v1875_v37 }
 0x241   : > { %v1148_v17 = vpop.permute.xlu1 %1147  ;;  %v1128_v21 = vpop.permute.xlu0 %1127  ;;  %1361 = vmatprep.subr.mxu0 %v1877_v43 }
 0x242   : > { %v1152_v26 = vsel %vm2127_vm14, %v1148_v17, %v1150_v36  ;;  %1362 = vmatpush1.msra.mxu0 %v1880_v44 }
 0x243   : > { %1363 = vmatprep.subr.mxu0 %v1883_v50  ;;  %v1304_v50 = vld [vmem:[%s2098_s5] sm:$0xff] }
 0x244   : > { %1364 = vmatpush1.msra.mxu0 %v1887_v55 }
 0x245   : > { %v1146_v8 = vpop.permute.xlu1 %1145  ;;  %v1126_v0 = vpop.permute.xlu0 %1125  ;;  %v1313_v38 = vld [vmem:[#allocation4 + $0x40] sm:$0xff]  ;;  %v1310_v27 = vld [vmem:[#allocation4 + $0x28] sm:$0xff]  ;;  %1365 = vmatprep.subr.mxu0 %v1193_v22 }
 0x246   : > { %v1151_v32 = vsel %vm2128_vm15, %v1146_v8, %v1148_v17  ;;  %v1131_v37 = vsel %vm2129_vm0, %v1126_v0, %v1128_v21  ;;  %1617 = vmatpush3.msra.mxu1 %v1313_v38  ;;  %1366 = vmatpush1.msra.mxu0 %v1192_v24 }
 0x247   : > { %1618 = vmatprep.subr.mxu1 %v1668_v4  ;;  %1367 = vmatprep.subr.mxu0 %v1173_v10 }
 0x248   : > { %1619 = vmatpush3.msra.mxu1 %v1310_v27  ;;  %1368 = vmatpush1.msra.mxu0 %v1172_v35 }
 0x249   : > { %v1130_v43 = vpop.permute.xlu1 %1129  ;;  %1369 = vmatprep.subr.mxu0 %v1152_v26  ;;  %1620 = vmatprep.subr.mxu1 %v1668_v4 }
 0x24a   : > { %v1132_v44 = vsel %vm2130_vm6, %v1128_v21, %v1130_v43  ;;  %1138 = vst.msk [vmem:[#allocation4 + $0x10] sm:$0xff] %vm779_vm10, %v1130_v43  ;;  %1370 = vmatpush1.msra.mxu0 %v1151_v32 }
 0x24b   : > { %1371 = vmatprep.subr.mxu0 %v1132_v44 }
 0x24c   : > { %1372 = vmatpush1.msra.mxu0 %v1131_v37 }
 0x24d   : > { %1558 = vmatmul.mubr.msk.f32.vlgmr.msra.gmra.mxu0 %vm616_vm9, %v1304_v50 }
 0x251   : > { %v1307_v55 = vld [vmem:[#allocation4 + $0x10] sm:$0xff] }
 0x252   : > { %1621 = vmatpush3.msra.mxu1 %v1307_v55  ;;  %v1336_v45 = vpop.permute.xlu0 %1335 }
 0x253   : > { %1623 = vmatmul.mubr.msk.f32.vlgmr.msra.gmra.mxu1 %vm616_vm9, %v1304_v50 }
 0x256   : > { %v973_v41 = vpop.permute.xlu1 %972 }
 0x2df   : > { %v1115_v39 = vpop.f32.mrf.mxu1 }
 0x2e0   : > { %v1116_v58 = vadd.f32 %v1115_v39, %v973_v41 }
 0x2e1   : > { %v1603_v4 = vpop.f32.mrf.mxu1 }
 0x2fb   : > { %v1044_v40 = vpop.f32.mrf.mxu0 }
 0x2fc   : > { %v1045_v47 = vadd.f32 %v1044_v40, %v973_v41 }
 0x2fd   : > { %v1046_v42 = vpop.f32.mrf.mxu0 }
 0x2fe   : > { %v1047_v51 = vadd.f32 %v1046_v42, %v973_v41 }
 0x30d   : > { %v1407_v46 = vpop.f32.mrf.mxu0 }
 0x30e   : > { %v1408_v48 = vadd.f32 %v1407_v46, %v1336_v45 }
 0x30f   : > { %v1409_v49 = vpop.f32.mrf.mxu0 }
 0x310   : > { %v1482_v52 = vadd.f32 %v1408_v48, %v1045_v47  ;;  %v1410_v53 = vadd.f32 %v1409_v49, %v1336_v45 }
 0x312   : > { %v1485_v54 = vmax.f32 %v1482_v52, 0.0  ;;  %v1483_v56 = vadd.f32 %v1410_v53, %v1047_v51 }
 0x313   : > { %v1478_v57 = vpop.f32.mrf.mxu1 }
 0x314   : > { %v1479_v59 = vadd.f32 %v1478_v57, %v1336_v45  ;;  %1488 = vst [vmem:[%s278_s14] sm:$0xff] %v1485_v54  ;;  %v1486_v60 = vmax.f32 %v1483_v56, 0.0 }
 0x315   : > { %v1624_v61 = vpop.f32.mrf.mxu1 }
 0x316   : > { %v1484_v62 = vadd.f32 %v1479_v59, %v1116_v58  ;;  %1489 = vst [vmem:[%s278_s14 + $0x8] sm:$0xff] %v1486_v60 }
 0x318   : > { %v1487_v63 = vmax.f32 %v1484_v62, 0.0 }
 0x31a   : > { %1490 = vst.msk [vmem:[%s278_s14 + $0x10] sm:$0xff] %vm779_vm10, %v1487_v63 }
 0x31b PF: > { %s17_s24 = sadd.s32 1, %s1658_s24  }
 0x31c   : > { %p14_p4 = scmp.ge.s32.totalorder %s17_s24, 4  }
 0x31e   :  { %16 = sbr.rel (!%p14_p4) target bundleno = 1 (0x1), region = 78 }

</bundles_post_ra>
